<compile_context>
chip_gen: v5e
topology: v5e:2x2
jax: 0.10.0
libtpu: 0.0.40
codegen_flags: <defaults>
</compile_context>

<pallas_src>
import jax
import jax.numpy as jnp
from jax.experimental import pallas as pl
from jax.experimental.pallas import tpu as pltpu

# ---- model dims (small, consistent with the forward pass semantics) ----
N = 2          # batch
CIN = 4        # input channels
H = W = 16     # spatial
COUT = 16      # backbone output channels
KH = KW = 3    # conv kernel
NUM_CLASSES = 8

K_RAW = KH * KW * CIN     # 36 im2col rows
K_PAD = 40                # + ones (bias) row + zero pad to a sublane multiple of 8
COUT_PAD = 24             # 16 features + 1 constant row + zero pad to multiple of 8
LANE_OUT = 128            # lane-dense pooled / output width (one full lane tile)


def toy_model_kernel(p_ref, wc_ref, avg_ref, wh_ref, o_ref):
    """Whole batch in one grid step; three MXU matmuls + one ReLU.

    p_ref  : [K_PAD, M]          im2col patches; row K_RAW is all-ones (conv bias),
                                 rows K_RAW+1.. are zero padding.
    wc_ref : [COUT_PAD, K_PAD]   conv weights (bias column at K_RAW); row COUT is
                                 e_{K_RAW}, so a constant-1 feature row rides
                                 through relu + pool and carries the head bias.
    avg_ref: [M, LANE_OUT]       block-diagonal averaging matrix (1/HW entries in
                                 the first N columns, zeros elsewhere).
    wh_ref : [C_PAD, COUT_PAD]   head weights transposed, head bias at column COUT.
    o_ref  : [C_PAD, LANE_OUT]   logits^T in the first N lanes (full-tile store).
    """
    # backbone: 3x3 conv (pad=1) + bias as one im2col matmul, then ReLU.
    feat = jnp.dot(wc_ref[...], p_ref[...],
                   preferred_element_type=jnp.float32)        # [COUT_PAD, M]
    feat = jnp.maximum(feat, 0.0)                             # ReLU (1-row stays 1)
    # neck: global average pool on the MXU (block-diagonal averaging matrix).
    pooled = jnp.dot(feat, avg_ref[...],
                     preferred_element_type=jnp.float32)      # [COUT_PAD, LANE_OUT]
    # head: linear; bias folded via the constant row of `pooled`.
    logits_t = jnp.dot(wh_ref[...], pooled,
                       preferred_element_type=jnp.float32)    # [C_PAD, LANE_OUT]
    o_ref[...] = logits_t.astype(o_ref.dtype)                 # unmasked full tile


def _build_patches(x_nchw):
    """[N,CIN,H,W] -> lane-dense im2col [K_PAD, N*H*W] as one concat fusion."""
    n, cin, h, w = x_nchw.shape
    m = n * h * w
    x_cnhw = jnp.transpose(x_nchw, (1, 0, 2, 3))                  # [CIN,N,H,W] (tiny)
    x_pad = jnp.pad(x_cnhw, ((0, 0), (0, 0), (1, 1), (1, 1)))     # [CIN,N,H+2,W+2]
    rows = []
    for dh in range(KH):
        for dw in range(KW):
            # tap emitted directly in final (kh,kw,cin)-row / (n,h,w)-column order
            rows.append(x_pad[:, :, dh:dh + h, dw:dw + w].reshape(cin, m))
    rows.append(jnp.ones((1, m), x_nchw.dtype))                   # conv-bias row
    rows.append(jnp.zeros((K_PAD - K_RAW - 1, m), x_nchw.dtype))  # sublane pad
    return jnp.concatenate(rows, axis=0)                          # [K_PAD, M]


def toy_model_forward(x_nchw, wc, bc, wh, bh):
    """x_nchw: [N, CIN, H, W] float32 -> logits [N, NUM_CLASSES]."""
    n, cin, h, w = x_nchw.shape
    hw = h * w
    m = n * hw
    num_classes = wh.shape[1]
    c_pad = -(-num_classes // 8) * 8
    assert n <= LANE_OUT, "batch must fit the lane-dense output tile"

    patches = _build_patches(x_nchw)                              # [K_PAD, M]

    # conv weights -> [COUT_PAD, K_PAD]: im2col-ordered rows, bias at col K_RAW,
    # plus the constant-forwarding row that picks the ones row of `patches`.
    w_rows = jnp.concatenate([
        wc.reshape(K_RAW, COUT),                                  # (kh,kw,cin) rows
        bc.reshape(1, COUT),
        jnp.zeros((K_PAD - K_RAW - 1, COUT), wc.dtype),
    ], axis=0)                                                    # [K_PAD, COUT]
    ones_fwd = jnp.zeros((1, K_PAD), wc.dtype).at[0, K_RAW].set(1.0)
    wc_aug = jnp.concatenate([
        w_rows.T, ones_fwd,
        jnp.zeros((COUT_PAD - COUT - 1, K_PAD), wc.dtype),
    ], axis=0)                                                    # [COUT_PAD, K_PAD]

    # head weights pre-transposed, head bias as column COUT, zero padded.
    wh_aug = jnp.concatenate([
        wh.T, bh.reshape(num_classes, 1),
        jnp.zeros((num_classes, COUT_PAD - COUT - 1), wh.dtype),
    ], axis=1)                                                    # [classes, COUT_PAD]
    wh_aug = jnp.concatenate([
        wh_aug, jnp.zeros((c_pad - num_classes, COUT_PAD), wh.dtype)], axis=0)

    # block-diagonal averaging matrix (static -> constant-folded under jit).
    batch_id = (jnp.arange(m, dtype=jnp.int32) // hw)[:, None]    # [M, 1]
    col_id = jnp.arange(LANE_OUT, dtype=jnp.int32)[None, :]       # [1, LANE_OUT]
    avg = jnp.where(batch_id == col_id,
                    jnp.float32(1.0 / hw), jnp.float32(0.0))      # [M, LANE_OUT]

    flops = 2 * (COUT_PAD * K_PAD * m + COUT_PAD * m * LANE_OUT
                 + c_pad * COUT_PAD * LANE_OUT)
    bytes_accessed = 4 * (K_PAD * m + COUT_PAD * K_PAD + m * LANE_OUT
                          + c_pad * COUT_PAD + c_pad * LANE_OUT)

    out_t = pl.pallas_call(
        toy_model_kernel,
        out_shape=jax.ShapeDtypeStruct((c_pad, LANE_OUT), jnp.float32),
        grid_spec=pl.GridSpec(
            grid=(1,),
            in_specs=[
                pl.BlockSpec((K_PAD, m), lambda i: (0, 0)),
                pl.BlockSpec((COUT_PAD, K_PAD), lambda i: (0, 0)),
                pl.BlockSpec((m, LANE_OUT), lambda i: (0, 0)),
                pl.BlockSpec((c_pad, COUT_PAD), lambda i: (0, 0)),
            ],
            out_specs=pl.BlockSpec((c_pad, LANE_OUT), lambda i: (0, 0)),
        ),
        compiler_params=pltpu.CompilerParams(
            dimension_semantics=("arbitrary",)),
        cost_estimate=pl.CostEstimate(
            flops=flops, transcendentals=0, bytes_accessed=bytes_accessed),
    )(patches, wc_aug, avg, wh_aug)

    # tiny slice + transpose of the lane-dense result back to [N, NUM_CLASSES].
    return out_t[:num_classes, :n].T


def reference_forward(x_nchw, wc, bc, wh, bh):
    """Plain-JAX reference with identical semantics (for a sanity check)."""
    x = jnp.transpose(x_nchw, (0, 2, 3, 1))                       # NHWC
    xp = jnp.pad(x, ((0, 0), (1, 1), (1, 1), (0, 0)))
    n = x.shape[0]
    acc = jnp.zeros((n, H, W, COUT), jnp.float32)
    for kh in range(KH):
        for kw in range(KW):
            patch = xp[:, kh:kh + H, kw:kw + W, :]                # [N,H,W,CIN]
            acc = acc + jnp.einsum('nhwc,cd->nhwd', patch, wc[kh, kw])
    feat = jnp.maximum(acc + bc[0], 0.0)
    pooled = jnp.mean(feat, axis=(1, 2))                          # [N, COUT]
    return pooled @ wh + bh[0]


if __name__ == "__main__":
    key = jax.random.PRNGKey(0)
    k_x, k_wc, k_bc, k_wh, k_bh = jax.random.split(key, 5)

    # deterministic parameter init (synthetic, no checkpoint load)
    x = jax.random.normal(k_x, (N, CIN, H, W), jnp.float32)
    wc = jax.random.normal(k_wc, (KH, KW, CIN, COUT), jnp.float32) * 0.1
    bc = jax.random.normal(k_bc, (1, COUT), jnp.float32) * 0.1
    wh = jax.random.normal(k_wh, (COUT, NUM_CLASSES), jnp.float32) * 0.1
    bh = jax.random.normal(k_bh, (1, NUM_CLASSES), jnp.float32) * 0.1

    fwd = jax.jit(toy_model_forward)
    out = jax.block_until_ready(fwd(x, wc, bc, wh, bh))

    ref = reference_forward(x, wc, bc, wh, bh)
    assert out.shape == (N, NUM_CLASSES)
    assert jnp.allclose(out, ref, atol=1e-4, rtol=1e-4), "mismatch vs reference"

    print("KERNEL_OK")
</pallas_src>

<mosaic_0001>
module attributes {stable_mosaic.version = 11 : i64} {
  func.func @toy_model_kernel(%arg0: i32, %arg1: memref<40x512xf32, #tpu.memory_space<vmem>>, %arg2: memref<24x40xf32, #tpu.memory_space<vmem>>, %arg3: memref<512x128xf32, #tpu.memory_space<vmem>>, %arg4: memref<8x24xf32, #tpu.memory_space<vmem>>, %arg5: memref<8x128xf32, #tpu.memory_space<vmem>>) attributes {dimension_semantics = [#tpu.dimension_semantics<arbitrary>], iteration_bounds = array<i64: 1>, scalar_prefetch = 0 : i64, scratch_operands = 0 : i64, tpu.core_type = #tpu.core_type<tc>, window_params = [{pipeline_mode = #tpu.pipeline_mode<synchronous>, transform_indices = @transform_0, window_bounds = array<i64: 40, 512>}, {pipeline_mode = #tpu.pipeline_mode<synchronous>, transform_indices = @transform_1, window_bounds = array<i64: 24, 40>}, {pipeline_mode = #tpu.pipeline_mode<synchronous>, transform_indices = @transform_2, window_bounds = array<i64: 512, 128>}, {pipeline_mode = #tpu.pipeline_mode<synchronous>, transform_indices = @transform_3, window_bounds = array<i64: 8, 24>}, {pipeline_mode = #tpu.pipeline_mode<synchronous>, transform_indices = @transform_4, window_bounds = array<i64: 8, 128>}]} {
    %c0 = arith.constant 0 : index
    %c0_0 = arith.constant 0 : index
    %0 = vector.load %arg2[%c0, %c0_0] : memref<24x40xf32, #tpu.memory_space<vmem>>, vector<24x40xf32>
    %c0_1 = arith.constant 0 : index
    %c0_2 = arith.constant 0 : index
    %1 = vector.load %arg1[%c0_1, %c0_2] : memref<40x512xf32, #tpu.memory_space<vmem>>, vector<40x512xf32>
    %cst = arith.constant dense<0.000000e+00> : vector<24x512xf32>
    %2 = tpu.matmul %0, %1, %cst {dimension_numbers = #tpu.dot_dimension_numbers<[1], [0], [0], [1], [0, 0, 1, 1], [], []>} : vector<24x40xf32>, vector<40x512xf32>, vector<24x512xf32> -> vector<24x512xf32>
    %cst_3 = arith.constant 0.000000e+00 : f32
    %3 = vector.broadcast %cst_3 : f32 to vector<24x512xf32>
    %4 = arith.maximumf %2, %3 : vector<24x512xf32>
    %c0_4 = arith.constant 0 : index
    %c0_5 = arith.constant 0 : index
    %5 = vector.load %arg3[%c0_4, %c0_5] : memref<512x128xf32, #tpu.memory_space<vmem>>, vector<512x128xf32>
    %cst_6 = arith.constant dense<0.000000e+00> : vector<24x128xf32>
    %6 = tpu.matmul %4, %5, %cst_6 {dimension_numbers = #tpu.dot_dimension_numbers<[1], [0], [0], [1], [0, 0, 1, 1], [], []>} : vector<24x512xf32>, vector<512x128xf32>, vector<24x128xf32> -> vector<24x128xf32>
    %c0_7 = arith.constant 0 : index
    %c0_8 = arith.constant 0 : index
    %7 = vector.load %arg4[%c0_7, %c0_8] : memref<8x24xf32, #tpu.memory_space<vmem>>, vector<8x24xf32>
    %cst_9 = arith.constant dense<0.000000e+00> : vector<8x128xf32>
    %8 = tpu.matmul %7, %6, %cst_9 {dimension_numbers = #tpu.dot_dimension_numbers<[1], [0], [0], [1], [0, 0, 1, 1], [], []>} : vector<8x24xf32>, vector<24x128xf32>, vector<8x128xf32> -> vector<8x128xf32>
    %c0_10 = arith.constant 0 : index
    %c0_11 = arith.constant 0 : index
    %9 = vector.load %arg5[%c0_10, %c0_11] : memref<8x128xf32, #tpu.memory_space<vmem>>, vector<8x128xf32>
    tpu.vector_store %arg5[%c0_10, %c0_11], %8 {strides = array<i32>} : memref<8x128xf32, #tpu.memory_space<vmem>>, vector<8x128xf32>,
    return
  }
  func.func @transform_0(%arg0: i32) -> (i32, i32) {
    %c0_i32 = arith.constant 0 : i32
    %c0_i32_0 = arith.constant 0 : i32
    %c0_i32_1 = arith.constant 0 : i32
    return %c0_i32, %c0_i32_0 : i32, i32
  }
  func.func @transform_1(%arg0: i32) -> (i32, i32) {
    %c0_i32 = arith.constant 0 : i32
    %c0_i32_0 = arith.constant 0 : i32
    %c0_i32_1 = arith.constant 0 : i32
    return %c0_i32, %c0_i32_0 : i32, i32
  }
  func.func @transform_2(%arg0: i32) -> (i32, i32) {
    %c0_i32 = arith.constant 0 : i32
    %c0_i32_0 = arith.constant 0 : i32
    %c0_i32_1 = arith.constant 0 : i32
    return %c0_i32, %c0_i32_0 : i32, i32
  }
  func.func @transform_3(%arg0: i32) -> (i32, i32) {
    %c0_i32 = arith.constant 0 : i32
    %c0_i32_0 = arith.constant 0 : i32
    %c0_i32_1 = arith.constant 0 : i32
    return %c0_i32, %c0_i32_0 : i32, i32
  }
  func.func @transform_4(%arg0: i32) -> (i32, i32) {
    %c0_i32 = arith.constant 0 : i32
    %c0_i32_0 = arith.constant 0 : i32
    %c0_i32_1 = arith.constant 0 : i32
    return %c0_i32, %c0_i32_0 : i32, i32
  }
}

</mosaic_0001>

<bundles_post_ra>
// kernel: toy_model_forward.1
= control target key start
LH: loop header
LB: loop body
LE: loop exit
PB: predicated region body
PF: predicated region fallthrough
CT: control target
= control target key end

     0   :  { %vm40_vm0 = vcmask 326656   ;;  %vm335_vm1 = vcmask 195584   ;;  %s681_s0 = inlined_call_operand.vmem [shape: f32[40,512], index: 0, kind: input, shape index: {}]   ;;  %s682_s1 = inlined_call_operand.vmem [shape: f32[24,40], index: 1, kind: input, shape index: {}]   ;;  %s683_s2 = inlined_call_operand.vmem [shape: f32[512,128], index: 2, kind: input, shape index: {}]   ;;  %s684_s3 = inlined_call_operand.vmem [shape: f32[8,24], index: 3, kind: input, shape index: {}]   ;;  %s685_s4 = inlined_call_operand.vmem [shape: f32[8,128], index: 4, kind: output, shape index: {}]  }
   0x1   :  { %v38_v0 = vld [vmem:[%s681_s0 + $0x90] sm:$0xff]  ;;  %v39_v2 = vld [vmem:[%s681_s0 + $0x98] sm:$0xff]  ;;  %v36_v7 = vld [vmem:[%s681_s0 + $0x80] sm:$0xff] }
   0x2   :  { %v34_v1 = vld [vmem:[%s681_s0 + $0x70] sm:$0xff]  ;;  %113 = vmatpush.msra.mxu2 %v38_v0  ;;  %139 = vmatpush.msra.mxu3 %v39_v2  ;;  %v35_v3 = vld [vmem:[%s681_s0 + $0x78] sm:$0xff]  ;;  %v37_v8 = vld [vmem:[%s681_s0 + $0x88] sm:$0xff] }
   0x3   :  { %v30_v4 = vld [vmem:[%s681_s0 + $0x50] sm:$0xff]  ;;  %v31_v5 = vld [vmem:[%s681_s0 + $0x58] sm:$0xff]  ;;  %61 = vmatpush.msra.mxu0 %v36_v7  ;;  %87 = vmatpush.msra.mxu1 %v37_v8  ;;  %v32_v10 = vld [vmem:[%s681_s0 + $0x60] sm:$0xff] }
   0x4   :  { %114 = vmatpush.msra.mxu2 %v34_v1  ;;  %140 = vmatpush.msra.mxu3 %v35_v3  ;;  %v26_v6 = vld [vmem:[%s681_s0 + $0x30] sm:$0xff]  ;;  %v27_v9 = vld [vmem:[%s681_s0 + $0x38] sm:$0xff]  ;;  %v33_v11 = vld [vmem:[%s681_s0 + $0x68] sm:$0xff] }
   0x5   :  { %v28_v12 = vld [vmem:[%s681_s0 + $0x40] sm:$0xff]  ;;  %v29_v13 = vld [vmem:[%s681_s0 + $0x48] sm:$0xff]  ;;  %v22_v14 = vld [vmem:[%s681_s0 + $0x10] sm:$0xff]  ;;  %62 = vmatpush.msra.mxu0 %v32_v10  ;;  %88 = vmatpush.msra.mxu1 %v33_v11 }
   0x6   :  { %115 = vmatpush.msra.mxu2 %v30_v4  ;;  %141 = vmatpush.msra.mxu3 %v31_v5  ;;  %v23_v15 = vld [vmem:[%s681_s0 + $0x18] sm:$0xff]  ;;  %v17_v16 = vld [vmem:[%s682_s1] sm:$0xff]  ;;  %v25_v18 = vld [vmem:[%s681_s0 + $0x28] sm:$0xff] }
   0x7   :  { %63 = vmatpush.msra.mxu0 %v28_v12  ;;  %89 = vmatpush.msra.mxu1 %v29_v13  ;;  %v24_v17 = vld [vmem:[%s681_s0 + $0x20] sm:$0xff]  ;;  %v213_v19 = vld [vmem:[%s683_s2 + $0x178] sm:$0xff]  ;;  %v21_v22 = vld [vmem:[%s681_s0 + $0x8] sm:$0xff] }
   0x8   :  { %116 = vmatpush.msra.mxu2 %v26_v6  ;;  %142 = vmatpush.msra.mxu3 %v27_v9  ;;  %v229_v20 = vld [vmem:[%s683_s2 + $0x1f8] sm:$0xff]  ;;  %v20_v21 = vld [vmem:[%s681_s0] sm:$0xff]  ;;  %v212_v23 = vld [vmem:[%s683_s2 + $0x170] sm:$0xff] }
   0x9   :  { %64 = vmatpush.msra.mxu0 %v24_v17  ;;  %90 = vmatpush.msra.mxu1 %v25_v18  ;;  %v181_v24 = vld [vmem:[%s683_s2 + $0x78] sm:$0xff]  ;;  %v228_v26 = vld [vmem:[%s683_s2 + $0x1f0] sm:$0xff]  ;;  %v211_v27 = vld [vmem:[%s683_s2 + $0x168] sm:$0xff] }
   0xa   :  { %117 = vmatpush.msra.mxu2 %v22_v14  ;;  %143 = vmatpush.msra.mxu3 %v23_v15  ;;  %v197_v25 = vld [vmem:[%s683_s2 + $0xf8] sm:$0xff]  ;;  %v180_v28 = vld [vmem:[%s683_s2 + $0x70] sm:$0xff]  ;;  %v18_v29 = vld [vmem:[%s682_s1 + $0x8] sm:$0xff] }
   0xb   :  { %370 = vmatmul.msk.f32.vlgmr.msra.gmra.mxu2 %vm40_vm0, %v17_v16  ;;  %373 = vmatmul.msk.f32.vlgmr.msra.gmra.mxu3 %vm40_vm0, %v17_v16  ;;  %v196_v30 = vld [vmem:[%s683_s2 + $0xf0] sm:$0xff]  ;;  %v210_v31 = vld [vmem:[%s683_s2 + $0x160] sm:$0xff]  ;;  %v227_v32 = vld [vmem:[%s683_s2 + $0x1e8] sm:$0xff] }
   0xc   :  { %282 = vmatpush.msrb.mxu2 %v213_v19  ;;  %308 = vmatpush.msrb.mxu3 %v229_v20  ;;  %v179_v33 = vld [vmem:[%s683_s2 + $0x68] sm:$0xff]  ;;  %v209_v35 = vld [vmem:[%s683_s2 + $0x158] sm:$0xff]  ;;  %v226_v36 = vld [vmem:[%s683_s2 + $0x1e0] sm:$0xff] }
   0xd   :  { %65 = vmatpush.msra.mxu0 %v20_v21  ;;  %91 = vmatpush.msra.mxu1 %v21_v22  ;;  %v195_v34 = vld [vmem:[%s683_s2 + $0xe8] sm:$0xff]  ;;  %v178_v37 = vld [vmem:[%s683_s2 + $0x60] sm:$0xff]  ;;  %v208_v39 = vld [vmem:[%s683_s2 + $0x150] sm:$0xff] }
   0xe   :  { %364 = vmatmul.msk.f32.vlgmr.msra.gmra.mxu0 %vm40_vm0, %v17_v16  ;;  %367 = vmatmul.msk.f32.vlgmr.msra.gmra.mxu1 %vm40_vm0, %v17_v16  ;;  %v194_v38 = vld [vmem:[%s683_s2 + $0xe0] sm:$0xff]  ;;  %v225_v40 = vld [vmem:[%s683_s2 + $0x1d8] sm:$0xff]  ;;  %v19_v42 = vld [vmem:[%s682_s1 + $0x10] sm:$0xff] }
   0xf   :  { %283 = vmatpush.msrb.mxu2 %v212_v23  ;;  %230 = vmatpush.msrb.mxu0 %v181_v24  ;;  %v177_v41 = vld [vmem:[%s683_s2 + $0x58] sm:$0xff]  ;;  %v207_v44 = vld [vmem:[%s683_s2 + $0x148] sm:$0xff]  ;;  %v224_v45 = vld [vmem:[%s683_s2 + $0x1d0] sm:$0xff] }
  0x10   :  { %256 = vmatpush.msrb.mxu1 %v197_v25  ;;  %309 = vmatpush.msrb.mxu3 %v228_v26  ;;  %v193_v43 = vld [vmem:[%s683_s2 + $0xd8] sm:$0xff]  ;;  %v176_v46 = vld [vmem:[%s683_s2 + $0x50] sm:$0xff]  ;;  %v206_v48 = vld [vmem:[%s683_s2 + $0x140] sm:$0xff] }
  0x11   :  { %284 = vmatpush.msrb.mxu2 %v211_v27  ;;  %231 = vmatpush.msrb.mxu0 %v180_v28  ;;  %v192_v47 = vld [vmem:[%s683_s2 + $0xd0] sm:$0xff]  ;;  %v223_v49 = vld [vmem:[%s683_s2 + $0x1c8] sm:$0xff]  ;;  %v205_v52 = vld [vmem:[%s683_s2 + $0x138] sm:$0xff] }
  0x12   :  { %257 = vmatpush.msrb.mxu1 %v196_v30  ;;  %310 = vmatpush.msrb.mxu3 %v227_v32  ;;  %v175_v50 = vld [vmem:[%s683_s2 + $0x48] sm:$0xff]  ;;  %v222_v53 = vld [vmem:[%s683_s2 + $0x1c0] sm:$0xff]  ;;  %v204_v56 = vld [vmem:[%s683_s2 + $0x130] sm:$0xff] }
  0x13   :  { %371 = vmatmul.msk.f32.gmra.mxu2 %vm40_vm0, %v18_v29  ;;  %374 = vmatmul.msk.f32.gmra.mxu3 %vm40_vm0, %v18_v29  ;;  %v191_v51 = vld [vmem:[%s683_s2 + $0xc8] sm:$0xff]  ;;  %v174_v54 = vld [vmem:[%s683_s2 + $0x40] sm:$0xff]  ;;  %v221_v57 = vld [vmem:[%s683_s2 + $0x1b8] sm:$0xff] }
  0x14   :  { %285 = vmatpush.msrb.mxu2 %v210_v31  ;;  %232 = vmatpush.msrb.mxu0 %v179_v33  ;;  %v190_v55 = vld [vmem:[%s683_s2 + $0xc0] sm:$0xff]  ;;  %v173_v58 = vld [vmem:[%s683_s2 + $0x38] sm:$0xff]  ;;  %v203_v60 = vld [vmem:[%s683_s2 + $0x128] sm:$0xff] }
  0x15   :  { %258 = vmatpush.msrb.mxu1 %v195_v34  ;;  %311 = vmatpush.msrb.mxu3 %v226_v36  ;;  %v189_v59 = vld [vmem:[%s683_s2 + $0xb8] sm:$0xff]  ;;  %v220_v61 = vld [vmem:[%s683_s2 + $0x1b0] sm:$0xff]  ;;  %v202_v0 = vld [vmem:[%s683_s2 + $0x120] sm:$0xff] }
  0x16   :  { %286 = vmatpush.msrb.mxu2 %v209_v35  ;;  %365 = vmatmul.msk.f32.gmra.mxu0 %vm40_vm0, %v18_v29  ;;  %v172_v62 = vld [vmem:[%s683_s2 + $0x30] sm:$0xff]  ;;  %v219_v1 = vld [vmem:[%s683_s2 + $0x1a8] sm:$0xff]  ;;  %v201_v4 = vld [vmem:[%s683_s2 + $0x118] sm:$0xff] }
  0x17   :  { %368 = vmatmul.msk.f32.gmra.mxu1 %vm40_vm0, %v18_v29  ;;  %233 = vmatpush.msrb.mxu0 %v178_v37  ;;  %v188_v63 = vld [vmem:[%s683_s2 + $0xb0] sm:$0xff]  ;;  %v171_v2 = vld [vmem:[%s683_s2 + $0x28] sm:$0xff]  ;;  %v218_v5 = vld [vmem:[%s683_s2 + $0x1a0] sm:$0xff] }
  0x18   :  { %259 = vmatpush.msrb.mxu1 %v194_v38  ;;  %287 = vmatpush.msrb.mxu2 %v208_v39  ;;  %v187_v3 = vld [vmem:[%s683_s2 + $0xa8] sm:$0xff]  ;;  %v170_v6 = vld [vmem:[%s683_s2 + $0x20] sm:$0xff]  ;;  %v200_v8 = vld [vmem:[%s683_s2 + $0x110] sm:$0xff] }
  0x19   :  { %312 = vmatpush.msrb.mxu3 %v225_v40  ;;  %234 = vmatpush.msrb.mxu0 %v177_v41  ;;  %v186_v7 = vld [vmem:[%s683_s2 + $0xa0] sm:$0xff]  ;;  %v217_v9 = vld [vmem:[%s683_s2 + $0x198] sm:$0xff]  ;;  %v199_v12 = vld [vmem:[%s683_s2 + $0x108] sm:$0xff] }
  0x1a   :  { %260 = vmatpush.msrb.mxu1 %v193_v43  ;;  %288 = vmatpush.msrb.mxu2 %v207_v44  ;;  %v169_v10 = vld [vmem:[%s683_s2 + $0x18] sm:$0xff]  ;;  %v216_v13 = vld [vmem:[%s683_s2 + $0x190] sm:$0xff]  ;;  %v198_v16 = vld [vmem:[%s683_s2 + $0x100] sm:$0xff] }
  0x1b   :  { %372 = vmatmul.msk.f32.gmra.mxu2 %vm40_vm0, %v19_v42  ;;  %375 = vmatmul.msk.f32.gmra.mxu3 %vm40_vm0, %v19_v42  ;;  %v185_v11 = vld [vmem:[%s683_s2 + $0x98] sm:$0xff]  ;;  %v168_v14 = vld [vmem:[%s683_s2 + $0x10] sm:$0xff]  ;;  %v215_v17 = vld [vmem:[%s683_s2 + $0x188] sm:$0xff] }
  0x1c   :  { %313 = vmatpush.msrb.mxu3 %v224_v45  ;;  %235 = vmatpush.msrb.mxu0 %v176_v46  ;;  %v184_v15 = vld [vmem:[%s683_s2 + $0x90] sm:$0xff]  ;;  %v167_v18 = vld [vmem:[%s683_s2 + $0x8] sm:$0xff]  ;;  %v214_v20 = vld [vmem:[%s683_s2 + $0x180] sm:$0xff] }
  0x1d   :  { %261 = vmatpush.msrb.mxu1 %v192_v47  ;;  %289 = vmatpush.msrb.mxu2 %v206_v48  ;;  %v183_v19 = vld [vmem:[%s683_s2 + $0x88] sm:$0xff]  ;;  %v166_v21 = vld [vmem:[%s683_s2] sm:$0xff] }
  0x1e   :  { %366 = vmatmul.msk.f32.gmra.mxu0 %vm40_vm0, %v19_v42  ;;  %314 = vmatpush.msrb.mxu3 %v223_v49  ;;  %v182_v22 = vld [vmem:[%s683_s2 + $0x80] sm:$0xff] }
  0x1f   :  { %369 = vmatmul.msk.f32.gmra.mxu1 %vm40_vm0, %v19_v42  ;;  %236 = vmatpush.msrb.mxu0 %v175_v50 }
  0x20   :  { %262 = vmatpush.msrb.mxu1 %v191_v51  ;;  %290 = vmatpush.msrb.mxu2 %v205_v52 }
  0x21   :  { %315 = vmatpush.msrb.mxu3 %v222_v53  ;;  %237 = vmatpush.msrb.mxu0 %v174_v54 }
  0x22   :  { %263 = vmatpush.msrb.mxu1 %v190_v55  ;;  %291 = vmatpush.msrb.mxu2 %v204_v56 }
  0x23   :  { %316 = vmatpush.msrb.mxu3 %v221_v57  ;;  %238 = vmatpush.msrb.mxu0 %v173_v58 }
  0x24   :  { %264 = vmatpush.msrb.mxu1 %v189_v59  ;;  %292 = vmatpush.msrb.mxu2 %v203_v60 }
  0x25   :  { %317 = vmatpush.msrb.mxu3 %v220_v61  ;;  %239 = vmatpush.msrb.mxu0 %v172_v62 }
  0x26   :  { %265 = vmatpush.msrb.mxu1 %v188_v63  ;;  %293 = vmatpush.msrb.mxu2 %v202_v0 }
  0x27   :  { %318 = vmatpush.msrb.mxu3 %v219_v1  ;;  %240 = vmatpush.msrb.mxu0 %v171_v2 }
  0x28   :  { %266 = vmatpush.msrb.mxu1 %v187_v3  ;;  %294 = vmatpush.msrb.mxu2 %v201_v4  ;;  %v334_v4 = vld [vmem:[%s684_s3] sm:$0xff] }
  0x29   :  { %319 = vmatpush.msrb.mxu3 %v218_v5  ;;  %241 = vmatpush.msrb.mxu0 %v170_v6 }
  0x2a   :  { %267 = vmatpush.msrb.mxu1 %v186_v7  ;;  %295 = vmatpush.msrb.mxu2 %v200_v8 }
  0x2b   :  { %320 = vmatpush.msrb.mxu3 %v217_v9  ;;  %242 = vmatpush.msrb.mxu0 %v169_v10 }
  0x2c   :  { %268 = vmatpush.msrb.mxu1 %v185_v11  ;;  %296 = vmatpush.msrb.mxu2 %v199_v12 }
  0x2d   :  { %321 = vmatpush.msrb.mxu3 %v216_v13  ;;  %243 = vmatpush.msrb.mxu0 %v168_v14 }
  0x2e   :  { %269 = vmatpush.msrb.mxu1 %v184_v15  ;;  %297 = vmatpush.msrb.mxu2 %v198_v16 }
  0x2f   :  { %322 = vmatpush.msrb.mxu3 %v215_v17  ;;  %244 = vmatpush.msrb.mxu0 %v167_v18 }
  0x30   :  { %270 = vmatpush.msrb.mxu1 %v183_v19 }
  0x31   :  { %323 = vmatpush.msrb.mxu3 %v214_v20  ;;  %245 = vmatpush.msrb.mxu0 %v166_v21 }
  0x32   :  { %271 = vmatpush.msrb.mxu1 %v182_v22 }
  0x8b   :  { %v67_v23 = vpop.f32.mrf.mxu0  ;;  %v93_v24 = vpop.f32.mrf.mxu1 }
  0x8c   :  { %v154_v25 = vmax.f32 %v67_v23, 0.0  ;;  %v155_v26 = vmax.f32 %v93_v24, 0.0 }
  0x8e   :  { %v119_v27 = vpop.f32.mrf.mxu2  ;;  %v145_v28 = vpop.f32.mrf.mxu3  ;;  %246 = vmatmul.f32.vlgmr.msrb.gmra.mxu0 %v154_v25  ;;  %272 = vmatmul.f32.vlgmr.msrb.gmra.mxu1 %v155_v26 }
  0x8f   :  { %v156_v29 = vmax.f32 %v119_v27, 0.0  ;;  %v157_v30 = vmax.f32 %v145_v28, 0.0 }
  0x91   :  { %298 = vmatmul.f32.vlgmr.msrb.gmra.mxu2 %v156_v29  ;;  %324 = vmatmul.f32.vlgmr.msrb.gmra.mxu3 %v157_v30 }
  0x93   :  { %v70_v31 = vpop.f32.mrf.mxu0 }
  0x94   :  { %v96_v32 = vpop.f32.mrf.mxu1  ;;  %v158_v33 = vmax.f32 %v70_v31, 0.0 }
  0x95   :  { %v159_v34 = vmax.f32 %v96_v32, 0.0 }
  0x96   :  { %v122_v35 = vpop.f32.mrf.mxu2  ;;  %v148_v36 = vpop.f32.mrf.mxu3  ;;  %249 = vmatmul.f32.gmra.mxu0 %v158_v33 }
  0x97   :  { %v160_v37 = vmax.f32 %v122_v35, 0.0  ;;  %v161_v38 = vmax.f32 %v148_v36, 0.0  ;;  %275 = vmatmul.f32.gmra.mxu1 %v159_v34 }
  0x99   :  { %301 = vmatmul.f32.gmra.mxu2 %v160_v37  ;;  %327 = vmatmul.f32.gmra.mxu3 %v161_v38 }
  0x9b   :  { %v73_v39 = vpop.f32.mrf.mxu0 }
  0x9c   :  { %v99_v40 = vpop.f32.mrf.mxu1  ;;  %v162_v41 = vmax.f32 %v73_v39, 0.0 }
  0x9d   :  { %v163_v42 = vmax.f32 %v99_v40, 0.0 }
  0x9e   :  { %v125_v43 = vpop.f32.mrf.mxu2  ;;  %v151_v44 = vpop.f32.mrf.mxu3  ;;  %252 = vmatmul.f32.gmra.mxu0 %v162_v41 }
  0x9f   :  { %v164_v45 = vmax.f32 %v125_v43, 0.0  ;;  %v165_v46 = vmax.f32 %v151_v44, 0.0  ;;  %278 = vmatmul.f32.gmra.mxu1 %v163_v42 }
  0xa1   :  { %304 = vmatmul.f32.gmra.mxu2 %v164_v45  ;;  %330 = vmatmul.f32.gmra.mxu3 %v165_v46 }
 0x10b   :  { %v247_v47 = vpop.f32.mrf.mxu0  ;;  %v273_v48 = vpop.f32.mrf.mxu1 }
 0x10c   :  { %v274_v59 = vadd.f32 %v273_v48, %v247_v47 }
 0x113   :  { %v250_v51 = vpop.f32.mrf.mxu0 }
 0x114   :  { %v299_v49 = vpop.f32.mrf.mxu2  ;;  %v325_v50 = vpop.f32.mrf.mxu3 }
 0x115   :  { %v276_v52 = vpop.f32.mrf.mxu1  ;;  %v300_v0 = vadd.f32 %v299_v49, %v274_v59 }
 0x116   :  { %v277_v57 = vadd.f32 %v276_v52, %v250_v51 }
 0x117   :  { %v326_v3 = vadd.f32 %v325_v50, %v300_v0 }
 0x11b   :  { %v253_v55 = vpop.f32.mrf.mxu0 }
 0x11c   :  { %v302_v53 = vpop.f32.mrf.mxu2  ;;  %v328_v54 = vpop.f32.mrf.mxu3 }
 0x11d   :  { %v279_v56 = vpop.f32.mrf.mxu1  ;;  %v303_v62 = vadd.f32 %v302_v53, %v277_v57 }
 0x11e   :  { %v280_v58 = vadd.f32 %v279_v56, %v253_v55 }
 0x11f   :  { %v329_v2 = vadd.f32 %v328_v54, %v303_v62 }
 0x124   :  { %v305_v60 = vpop.f32.mrf.mxu2  ;;  %v331_v61 = vpop.f32.mrf.mxu3 }
 0x125   :  { %v306_v63 = vadd.f32 %v305_v60, %v280_v58 }
 0x127   :  { %v332_v1 = vadd.f32 %v331_v61, %v306_v63 }
 0x129   :  { %352 = vmatpush.msra.mxu0 %v332_v1 }
 0x12b   :  { %353 = vmatpush.msra.mxu0 %v329_v2 }
 0x12d   :  { %354 = vmatpush.msra.mxu0 %v326_v3 }
 0x12e   :  { %376 = vmatmul.msk.f32.vlgmr.msra.gmra.mxu0 %vm335_vm1, %v334_v4 }
 0x1ab   :  { %v356_v5 = vpop.f32.mrf.mxu0 }
 0x1ac   :  { %359 = vst [vmem:[%s685_s4] sm:$0xff] %v356_v5 }

</bundles_post_ra>
